<compile_context>
chip_gen: v6e
topology: v6e:2x2x1
jax: 0.10.0
libtpu: 0.0.40
codegen_flags: <defaults>
</compile_context>

<pallas_src>
import functools

import jax
import jax.numpy as jnp
from jax import lax
from jax.experimental import pallas as pl
from jax.experimental.pallas import tpu as pltpu


def _lane_pad(W):
    """Lane padding on each side of the flattened-spatial staging buffer.

    Must be >= W+1 (the largest |tap shift| of a 3x3 conv); rounded to a multiple of
    128 so the interior store of the staging buffer is lane-aligned.
    """
    return ((W + 1 + 127) // 128) * 128


def _anchor_free_kernel(x_ref, coords_ref, w1_ref, b1_ref, w2_ref, b2_ref,
                        o_ref, xpf_ref, col_ref, *, H, W):
    """One grid step = NB batch elements.

    x_ref     : (NB, Cin, H*W)        input, NCHW with flattened spatial (lanes = H*W)
    coords_ref: (2, H*W) int32        row 0 = y index, row 1 = x index of each lane
    w1_ref    : (Cmid, 9*Cin)         3x3 conv weight, BN folded, tap-major rows
    b1_ref    : (Cmid, 1) f32         3x3 conv bias with BN folded in
    w2_ref    : (Cout, Cmid)          1x1 conv weight (transposed)
    b2_ref    : (Cout, 1) f32         1x1 conv bias
    o_ref     : (NB, Cout, H*W)       output, NCHW with flattened spatial (lane-dense)
    xpf_ref   : (NB*Cin, H*W + 2*pad) f32 scratch: zero-padded flat staging buffer
    col_ref   : (9*Cin, NB*H*W)       f32 scratch: im2col slab (contraction x spatial)
    """
    NB, Cin, HW = x_ref.shape
    assert HW == H * W
    pad = _lane_pad(W)
    mm_dtype = w1_ref.dtype            # f32, or bf16 for the v6e/v7x MXU fast path

    # Stage the input into a zero-padded flat-spatial buffer so every 3x3 tap becomes
    # an in-bounds lane-window read at a static offset (no strided relayouts per tap).
    xpf_ref[...] = jnp.zeros(xpf_ref.shape, xpf_ref.dtype)
    for nb in range(NB):
        xpf_ref[nb * Cin:(nb + 1) * Cin, pad:pad + HW] = x_ref[nb, :, :]

    yy = coords_ref[0:1, :]            # (1, HW)
    xx = coords_ref[1:2, :]            # (1, HW)

    # im2col: col[(dy*3+dx)*Cin + c, nb*HW + y*W + x] = zero_padded_x[nb, c, y+dy-1, x+dx-1]
    for dy in range(3):
        for dx in range(3):
            oy, ox = dy - 1, dx - 1
            shift = oy * W + ox
            win = xpf_ref[:, pad + shift: pad + shift + HW]          # (NB*Cin, HW)
            mask = ((yy + oy >= 0) & (yy + oy < H) &
                    (xx + ox >= 0) & (xx + ox < W))                  # (1, HW)
            slab = jnp.where(mask, win, 0.0)
            tap = dy * 3 + dx
            for nb in range(NB):
                col_ref[tap * Cin:(tap + 1) * Cin, nb * HW:(nb + 1) * HW] = (
                    slab[nb * Cin:(nb + 1) * Cin, :])

    # 3x3 conv (+ folded BN) as ONE fat matmul on the MXU, spatial on lanes.
    h = jnp.dot(w1_ref[...], col_ref[...].astype(mm_dtype),
                preferred_element_type=jnp.float32)                  # (Cmid, NB*HW)
    h = jnp.maximum(h + b1_ref[...], 0.0)                            # bias + ReLU in f32

    # 1x1 conv == (Cout, Cmid) @ (Cmid, NB*HW); result stays lane-dense.
    out = jnp.dot(w2_ref[...], h.astype(mm_dtype),
                  preferred_element_type=jnp.float32) + b2_ref[...]  # (Cout, NB*HW)

    # Lane-dense stores: (Cout, H*W) per batch element, H*W a multiple of 128 here.
    for nb in range(NB):
        o_ref[nb, :, :] = out[:, nb * HW:(nb + 1) * HW].astype(o_ref.dtype)


def _step_vmem_bytes(nb, Cin, Cmid, Cout, HW, pad):
    f32 = 4
    return (2 * nb * Cin * HW * f32             # double-buffered input block
            + 2 * nb * Cout * HW * f32          # double-buffered output block
            + nb * Cin * (HW + 2 * pad) * f32   # flat padded staging scratch
            + 9 * Cin * nb * HW * f32           # im2col scratch
            + 2 * 2 * HW * f32                  # coords (double-buffered)
            + (Cmid * 9 * Cin + Cout * Cmid + Cmid + Cout) * f32)


def _pick_batch_block(N, Cin, Cmid, Cout, HW, pad, max_nb=8, budget=8 * 2**20):
    """Largest divisor of N (<= max_nb) whose per-step VMEM footprint fits the budget."""
    best = 1
    for cand in range(1, min(N, max_nb) + 1):
        if N % cand == 0 and _step_vmem_bytes(cand, Cin, Cmid, Cout, HW, pad) <= budget:
            best = cand
    return best


def anchor_free_forward(u_nchw, params, *, compute_dtype=jnp.float32):
    """u_nchw: (N, Cin, H, W) float32 (PyTorch layout). Returns (N, Cout, H, W) float32.

    compute_dtype: dtype of the MXU matmul operands (jnp.float32 or jnp.bfloat16).
    Accumulation and all elementwise math stay in float32.
    """
    w1, b1 = params["w1"], params["b1"]
    gamma, beta = params["gamma"], params["beta"]
    mean, var, eps = params["run_mean"], params["run_var"], params["eps"]
    w2, b2 = params["w2"], params["b2"]

    N, Cin, H, W = u_nchw.shape
    Cmid = w1.shape[3]
    Cout = w2.shape[1]
    HW = H * W
    pad = _lane_pad(W)

    # ---- fold eval-mode BatchNorm into the 3x3 conv: w1' = w1*scale, b1' = b1*scale+shift
    scale = gamma / jnp.sqrt(var + eps)                               # (Cmid,)
    w1f = w1 * scale[None, None, None, :]                             # (3,3,Cin,Cmid) HWIO
    b1f = b1 * scale + (beta - mean * scale)                          # (Cmid,)

    # ---- weights-stationary layouts: row = output channel, column = contraction
    # w1r[m, (dy*3+dx)*Cin + c] = w1f[dy, dx, c, m]
    w1r = jnp.transpose(w1f, (3, 0, 1, 2)).reshape(Cmid, 9 * Cin).astype(compute_dtype)
    w2t = jnp.transpose(w2, (1, 0)).astype(compute_dtype)             # (Cout, Cmid)
    b1r = b1f.reshape(Cmid, 1).astype(jnp.float32)
    b2r = b2.reshape(Cout, 1).astype(jnp.float32)

    # ---- free layout plumbing only: NCHW stays NCHW, spatial flattens row-major
    xf = u_nchw.reshape(N, Cin, HW)

    # per-lane (y, x) coordinates for in-kernel boundary masking (no int div in-kernel)
    ar = jnp.arange(HW, dtype=jnp.int32)
    coords = jnp.stack([ar // W, ar % W], axis=0)                     # (2, HW)

    # ---- batch blocking: amortize per-grid-step pipeline overhead, budget VMEM
    nb = _pick_batch_block(N, Cin, Cmid, Cout, HW, pad)
    step_bytes = _step_vmem_bytes(nb, Cin, Cmid, Cout, HW, pad)
    vmem_limit = int(min(48 * 2**20, max(32 * 2**20, 4 * step_bytes)))

    kernel = functools.partial(_anchor_free_kernel, H=H, W=W)

    out_flat = pl.pallas_call(
        kernel,
        out_shape=jax.ShapeDtypeStruct((N, Cout, HW), jnp.float32),
        grid_spec=pltpu.PrefetchScalarGridSpec(
            num_scalar_prefetch=0,
            grid=(N // nb,),
            in_specs=[
                pl.BlockSpec((nb, Cin, HW), lambda i: (i, 0, 0)),
                pl.BlockSpec((2, HW), lambda i: (0, 0)),
                pl.BlockSpec((Cmid, 9 * Cin), lambda i: (0, 0)),
                pl.BlockSpec((Cmid, 1), lambda i: (0, 0)),
                pl.BlockSpec((Cout, Cmid), lambda i: (0, 0)),
                pl.BlockSpec((Cout, 1), lambda i: (0, 0)),
            ],
            out_specs=pl.BlockSpec((nb, Cout, HW), lambda i: (i, 0, 0)),
            scratch_shapes=[
                pltpu.VMEM((nb * Cin, HW + 2 * pad), jnp.float32),
                pltpu.VMEM((9 * Cin, nb * HW), jnp.float32),
            ],
        ),
        compiler_params=pltpu.CompilerParams(
            dimension_semantics=("parallel",),
            vmem_limit_bytes=vmem_limit),
    )(xf, coords, w1r, b1r, w2t, b2r)

    return out_flat.reshape(N, Cout, H, W)


def _reference_forward(u_nchw, params):
    """Pure-JAX reference (same eval-mode BN semantics) for verification."""
    w1, b1 = params["w1"], params["b1"]
    gamma, beta = params["gamma"], params["beta"]
    mean, var, eps = params["run_mean"], params["run_var"], params["eps"]
    w2, b2 = params["w2"], params["b2"]

    x = jnp.transpose(u_nchw, (0, 2, 3, 1))  # NHWC
    y = lax.conv_general_dilated(
        x, w1, window_strides=(1, 1), padding="SAME",
        dimension_numbers=("NHWC", "HWIO", "NHWC")) + b1
    y = (y - mean) / jnp.sqrt(var + eps) * gamma + beta
    y = jnp.maximum(y, 0.0)
    y = jnp.einsum("nhwc,co->nhwo", y, w2) + b2
    return jnp.transpose(y, (0, 3, 1, 2))


def make_params(in_channels, out_channels, key):
    cmid = in_channels // 2
    k = jax.random.split(key, 8)
    w1 = 0.1 * jax.random.normal(k[0], (3, 3, in_channels, cmid), jnp.float32)
    b1 = 0.1 * jax.random.normal(k[1], (cmid,), jnp.float32)
    gamma = 1.0 + 0.1 * jax.random.normal(k[2], (cmid,), jnp.float32)
    beta = 0.1 * jax.random.normal(k[3], (cmid,), jnp.float32)
    run_mean = 0.1 * jax.random.normal(k[4], (cmid,), jnp.float32)
    run_var = 0.5 + jnp.abs(jax.random.normal(k[5], (cmid,), jnp.float32))
    w2 = 0.1 * jax.random.normal(k[6], (cmid, out_channels), jnp.float32)
    b2 = 0.1 * jax.random.normal(k[7], (out_channels,), jnp.float32)
    return dict(w1=w1, b1=b1, gamma=gamma, beta=beta,
                run_mean=run_mean, run_var=run_var, eps=1e-5,
                w2=w2, b2=b2)


if __name__ == "__main__":
    key = jax.random.PRNGKey(0)
    k_in, k_p = jax.random.split(key)

    N, Cin, H, W = 2, 4, 16, 16
    Cout = 8

    u = jax.random.normal(k_in, (N, Cin, H, W), jnp.float32)
    params = make_params(Cin, Cout, k_p)

    ref = jax.block_until_ready(_reference_forward(u, params))

    # f32 MXU operands: exact check against the reference.
    out = jax.block_until_ready(anchor_free_forward(u, params))
    assert out.shape == (N, Cout, H, W)
    err = float(jnp.max(jnp.abs(out - ref)))
    assert err < 1e-4, f"f32 mismatch vs reference: {err}"

    # bf16 MXU operands (v6e/v7x fast path), f32 accumulate + f32 elementwise.
    out_bf16 = jax.block_until_ready(
        anchor_free_forward(u, params, compute_dtype=jnp.bfloat16))
    err_bf16 = float(jnp.max(jnp.abs(out_bf16 - ref)))
    assert err_bf16 < 5e-2, f"bf16 mismatch vs reference: {err_bf16}"

    print("KERNEL_OK")
</pallas_src>

<mosaic_0001>
module attributes {stable_mosaic.version = 11 : i64} {
  func.func @_anchor_free_kernel(%arg0: i32, %arg1: memref<2x4x256xf32, #tpu.memory_space<vmem>>, %arg2: memref<2x256xi32, #tpu.memory_space<vmem>>, %arg3: memref<2x36xf32, #tpu.memory_space<vmem>>, %arg4: memref<2x1xf32, #tpu.memory_space<vmem>>, %arg5: memref<8x2xf32, #tpu.memory_space<vmem>>, %arg6: memref<8x1xf32, #tpu.memory_space<vmem>>, %arg7: memref<2x8x256xf32, #tpu.memory_space<vmem>>, %arg8: memref<8x512xf32, #tpu.memory_space<vmem>>, %arg9: memref<36x512xf32, #tpu.memory_space<vmem>>) attributes {dimension_semantics = [#tpu.dimension_semantics<parallel>], iteration_bounds = array<i64: 1>, scalar_prefetch = 0 : i64, scratch_operands = 2 : i64, tpu.core_type = #tpu.core_type<tc>, window_params = [{transform_indices = @transform_0, window_bounds = array<i64: 2, 4, 256>}, {pipeline_mode = #tpu.pipeline_mode<synchronous>, transform_indices = @transform_1, window_bounds = array<i64: 2, 256>}, {pipeline_mode = #tpu.pipeline_mode<synchronous>, transform_indices = @transform_2, window_bounds = array<i64: 2, 36>}, {pipeline_mode = #tpu.pipeline_mode<synchronous>, transform_indices = @transform_3, window_bounds = array<i64: 2, 1>}, {pipeline_mode = #tpu.pipeline_mode<synchronous>, transform_indices = @transform_4, window_bounds = array<i64: 8, 2>}, {pipeline_mode = #tpu.pipeline_mode<synchronous>, transform_indices = @transform_5, window_bounds = array<i64: 8, 1>}, {transform_indices = @transform_6, window_bounds = array<i64: 2, 8, 256>}]} {
    %cst = arith.constant 0.000000e+00 : f32
    %0 = vector.broadcast %cst : f32 to vector<8x512xf32>
    %c0 = arith.constant 0 : index
    %c0_0 = arith.constant 0 : index
    %1 = vector.load %arg8[%c0, %c0_0] : memref<8x512xf32, #tpu.memory_space<vmem>>, vector<8x512xf32>
    tpu.vector_store %arg8[%c0, %c0_0], %0 {strides = array<i32>} : memref<8x512xf32, #tpu.memory_space<vmem>>, vector<8x512xf32>,
    %c0_1 = arith.constant 0 : index
    %c0_2 = arith.constant 0 : index
    %c0_3 = arith.constant 0 : index
    %2 = vector.load %arg1[%c0_1, %c0_2, %c0_3] : memref<2x4x256xf32, #tpu.memory_space<vmem>>, vector<1x4x256xf32>
    %3 = vector.shape_cast %2 : vector<1x4x256xf32> to vector<4x256xf32>
    %c0_4 = arith.constant 0 : index
    %c128 = arith.constant 128 : index
    %4 = vector.load %arg8[%c0_4, %c128] : memref<8x512xf32, #tpu.memory_space<vmem>>, vector<4x256xf32>
    tpu.vector_store %arg8[%c0_4, %c128], %3 {strides = array<i32>} : memref<8x512xf32, #tpu.memory_space<vmem>>, vector<4x256xf32>,
    %c1 = arith.constant 1 : index
    %c0_5 = arith.constant 0 : index
    %c0_6 = arith.constant 0 : index
    %5 = vector.load %arg1[%c1, %c0_5, %c0_6] : memref<2x4x256xf32, #tpu.memory_space<vmem>>, vector<1x4x256xf32>
    %6 = vector.shape_cast %5 : vector<1x4x256xf32> to vector<4x256xf32>
    %c4 = arith.constant 4 : index
    %c128_7 = arith.constant 128 : index
    %7 = vector.load %arg8[%c4, %c128_7] : memref<8x512xf32, #tpu.memory_space<vmem>>, vector<4x256xf32>
    tpu.vector_store %arg8[%c4, %c128_7], %6 {strides = array<i32>} : memref<8x512xf32, #tpu.memory_space<vmem>>, vector<4x256xf32>,
    %c0_8 = arith.constant 0 : index
    %c0_9 = arith.constant 0 : index
    %8 = vector.load %arg2[%c0_8, %c0_9] : memref<2x256xi32, #tpu.memory_space<vmem>>, vector<1x256xi32>
    %c1_10 = arith.constant 1 : index
    %c0_11 = arith.constant 0 : index
    %9 = vector.load %arg2[%c1_10, %c0_11] : memref<2x256xi32, #tpu.memory_space<vmem>>, vector<1x256xi32>
    %c0_12 = arith.constant 0 : index
    %c111 = arith.constant 111 : index
    %10 = vector.load %arg8[%c0_12, %c111] : memref<8x512xf32, #tpu.memory_space<vmem>>, vector<8x256xf32>
    %c-1_i32 = arith.constant -1 : i32
    %11 = vector.broadcast %c-1_i32 : i32 to vector<1x256xi32>
    %12 = arith.addi %8, %11 : vector<1x256xi32>
    %c0_i32 = arith.constant 0 : i32
    %13 = vector.broadcast %c0_i32 : i32 to vector<1x256xi32>
    %14 = arith.cmpi sge, %12, %13 : vector<1x256xi32>
    %c-1_i32_13 = arith.constant -1 : i32
    %15 = vector.broadcast %c-1_i32_13 : i32 to vector<1x256xi32>
    %16 = arith.addi %8, %15 : vector<1x256xi32>
    %c16_i32 = arith.constant 16 : i32
    %17 = vector.broadcast %c16_i32 : i32 to vector<1x256xi32>
    %18 = arith.cmpi slt, %16, %17 : vector<1x256xi32>
    %19 = arith.andi %14, %18 : vector<1x256xi1>
    %c-1_i32_14 = arith.constant -1 : i32
    %20 = vector.broadcast %c-1_i32_14 : i32 to vector<1x256xi32>
    %21 = arith.addi %9, %20 : vector<1x256xi32>
    %c0_i32_15 = arith.constant 0 : i32
    %22 = vector.broadcast %c0_i32_15 : i32 to vector<1x256xi32>
    %23 = arith.cmpi sge, %21, %22 : vector<1x256xi32>
    %24 = arith.andi %19, %23 : vector<1x256xi1>
    %c-1_i32_16 = arith.constant -1 : i32
    %25 = vector.broadcast %c-1_i32_16 : i32 to vector<1x256xi32>
    %26 = arith.addi %9, %25 : vector<1x256xi32>
    %c16_i32_17 = arith.constant 16 : i32
    %27 = vector.broadcast %c16_i32_17 : i32 to vector<1x256xi32>
    %28 = arith.cmpi slt, %26, %27 : vector<1x256xi32>
    %29 = arith.andi %24, %28 : vector<1x256xi1>
    %cst_18 = arith.constant 0.000000e+00 : f32
    %30 = vector.shape_cast %29 : vector<1x256xi1> to vector<1x256xi1>
    %31 = vector.broadcast %30 : vector<1x256xi1> to vector<8x256xi1>
    %32 = vector.broadcast %cst_18 : f32 to vector<8x256xf32>
    %33 = arith.select %31, %10, %32 : vector<8x256xi1>, vector<8x256xf32>
    %34 = vector.extract_strided_slice %33 {offsets = [0, 0], sizes = [4, 256], strides = [1, 1]} : vector<8x256xf32> to vector<4x256xf32>
    %c0_19 = arith.constant 0 : index
    %c0_20 = arith.constant 0 : index
    %35 = vector.load %arg9[%c0_19, %c0_20] : memref<36x512xf32, #tpu.memory_space<vmem>>, vector<4x256xf32>
    tpu.vector_store %arg9[%c0_19, %c0_20], %34 {strides = array<i32>} : memref<36x512xf32, #tpu.memory_space<vmem>>, vector<4x256xf32>,
    %36 = vector.extract_strided_slice %33 {offsets = [4, 0], sizes = [4, 256], strides = [1, 1]} : vector<8x256xf32> to vector<4x256xf32>
    %c0_21 = arith.constant 0 : index
    %c256 = arith.constant 256 : index
    %37 = vector.load %arg9[%c0_21, %c256] : memref<36x512xf32, #tpu.memory_space<vmem>>, vector<4x256xf32>
    tpu.vector_store %arg9[%c0_21, %c256], %36 {strides = array<i32>} : memref<36x512xf32, #tpu.memory_space<vmem>>, vector<4x256xf32>,
    %c0_22 = arith.constant 0 : index
    %c112 = arith.constant 112 : index
    %38 = vector.load %arg8[%c0_22, %c112] : memref<8x512xf32, #tpu.memory_space<vmem>>, vector<8x256xf32>
    %c-1_i32_23 = arith.constant -1 : i32
    %39 = vector.broadcast %c-1_i32_23 : i32 to vector<1x256xi32>
    %40 = arith.addi %8, %39 : vector<1x256xi32>
    %c0_i32_24 = arith.constant 0 : i32
    %41 = vector.broadcast %c0_i32_24 : i32 to vector<1x256xi32>
    %42 = arith.cmpi sge, %40, %41 : vector<1x256xi32>
    %c-1_i32_25 = arith.constant -1 : i32
    %43 = vector.broadcast %c-1_i32_25 : i32 to vector<1x256xi32>
    %44 = arith.addi %8, %43 : vector<1x256xi32>
    %c16_i32_26 = arith.constant 16 : i32
    %45 = vector.broadcast %c16_i32_26 : i32 to vector<1x256xi32>
    %46 = arith.cmpi slt, %44, %45 : vector<1x256xi32>
    %47 = arith.andi %42, %46 : vector<1x256xi1>
    %c0_i32_27 = arith.constant 0 : i32
    %48 = vector.broadcast %c0_i32_27 : i32 to vector<1x256xi32>
    %49 = arith.addi %9, %48 : vector<1x256xi32>
    %c0_i32_28 = arith.constant 0 : i32
    %50 = vector.broadcast %c0_i32_28 : i32 to vector<1x256xi32>
    %51 = arith.cmpi sge, %49, %50 : vector<1x256xi32>
    %52 = arith.andi %47, %51 : vector<1x256xi1>
    %c0_i32_29 = arith.constant 0 : i32
    %53 = vector.broadcast %c0_i32_29 : i32 to vector<1x256xi32>
    %54 = arith.addi %9, %53 : vector<1x256xi32>
    %c16_i32_30 = arith.constant 16 : i32
    %55 = vector.broadcast %c16_i32_30 : i32 to vector<1x256xi32>
    %56 = arith.cmpi slt, %54, %55 : vector<1x256xi32>
    %57 = arith.andi %52, %56 : vector<1x256xi1>
    %cst_31 = arith.constant 0.000000e+00 : f32
    %58 = vector.shape_cast %57 : vector<1x256xi1> to vector<1x256xi1>
    %59 = vector.broadcast %58 : vector<1x256xi1> to vector<8x256xi1>
    %60 = vector.broadcast %cst_31 : f32 to vector<8x256xf32>
    %61 = arith.select %59, %38, %60 : vector<8x256xi1>, vector<8x256xf32>
    %62 = vector.extract_strided_slice %61 {offsets = [0, 0], sizes = [4, 256], strides = [1, 1]} : vector<8x256xf32> to vector<4x256xf32>
    %c4_32 = arith.constant 4 : index
    %c0_33 = arith.constant 0 : index
    %63 = vector.load %arg9[%c4_32, %c0_33] : memref<36x512xf32, #tpu.memory_space<vmem>>, vector<4x256xf32>
    tpu.vector_store %arg9[%c4_32, %c0_33], %62 {strides = array<i32>} : memref<36x512xf32, #tpu.memory_space<vmem>>, vector<4x256xf32>,
    %64 = vector.extract_strided_slice %61 {offsets = [4, 0], sizes = [4, 256], strides = [1, 1]} : vector<8x256xf32> to vector<4x256xf32>
    %c4_34 = arith.constant 4 : index
    %c256_35 = arith.constant 256 : index
    %65 = vector.load %arg9[%c4_34, %c256_35] : memref<36x512xf32, #tpu.memory_space<vmem>>, vector<4x256xf32>
    tpu.vector_store %arg9[%c4_34, %c256_35], %64 {strides = array<i32>} : memref<36x512xf32, #tpu.memory_space<vmem>>, vector<4x256xf32>,
    %c0_36 = arith.constant 0 : index
    %c113 = arith.constant 113 : index
    %66 = vector.load %arg8[%c0_36, %c113] : memref<8x512xf32, #tpu.memory_space<vmem>>, vector<8x256xf32>
    %c-1_i32_37 = arith.constant -1 : i32
    %67 = vector.broadcast %c-1_i32_37 : i32 to vector<1x256xi32>
    %68 = arith.addi %8, %67 : vector<1x256xi32>
    %c0_i32_38 = arith.constant 0 : i32
    %69 = vector.broadcast %c0_i32_38 : i32 to vector<1x256xi32>
    %70 = arith.cmpi sge, %68, %69 : vector<1x256xi32>
    %c-1_i32_39 = arith.constant -1 : i32
    %71 = vector.broadcast %c-1_i32_39 : i32 to vector<1x256xi32>
    %72 = arith.addi %8, %71 : vector<1x256xi32>
    %c16_i32_40 = arith.constant 16 : i32
    %73 = vector.broadcast %c16_i32_40 : i32 to vector<1x256xi32>
    %74 = arith.cmpi slt, %72, %73 : vector<1x256xi32>
    %75 = arith.andi %70, %74 : vector<1x256xi1>
    %c1_i32 = arith.constant 1 : i32
    %76 = vector.broadcast %c1_i32 : i32 to vector<1x256xi32>
    %77 = arith.addi %9, %76 : vector<1x256xi32>
    %c0_i32_41 = arith.constant 0 : i32
    %78 = vector.broadcast %c0_i32_41 : i32 to vector<1x256xi32>
    %79 = arith.cmpi sge, %77, %78 : vector<1x256xi32>
    %80 = arith.andi %75, %79 : vector<1x256xi1>
    %c1_i32_42 = arith.constant 1 : i32
    %81 = vector.broadcast %c1_i32_42 : i32 to vector<1x256xi32>
    %82 = arith.addi %9, %81 : vector<1x256xi32>
    %c16_i32_43 = arith.constant 16 : i32
    %83 = vector.broadcast %c16_i32_43 : i32 to vector<1x256xi32>
    %84 = arith.cmpi slt, %82, %83 : vector<1x256xi32>
    %85 = arith.andi %80, %84 : vector<1x256xi1>
    %cst_44 = arith.constant 0.000000e+00 : f32
    %86 = vector.shape_cast %85 : vector<1x256xi1> to vector<1x256xi1>
    %87 = vector.broadcast %86 : vector<1x256xi1> to vector<8x256xi1>
    %88 = vector.broadcast %cst_44 : f32 to vector<8x256xf32>
    %89 = arith.select %87, %66, %88 : vector<8x256xi1>, vector<8x256xf32>
    %90 = vector.extract_strided_slice %89 {offsets = [0, 0], sizes = [4, 256], strides = [1, 1]} : vector<8x256xf32> to vector<4x256xf32>
    %c8 = arith.constant 8 : index
    %c0_45 = arith.constant 0 : index
    %91 = vector.load %arg9[%c8, %c0_45] : memref<36x512xf32, #tpu.memory_space<vmem>>, vector<4x256xf32>
    tpu.vector_store %arg9[%c8, %c0_45], %90 {strides = array<i32>} : memref<36x512xf32, #tpu.memory_space<vmem>>, vector<4x256xf32>,
    %92 = vector.extract_strided_slice %89 {offsets = [4, 0], sizes = [4, 256], strides = [1, 1]} : vector<8x256xf32> to vector<4x256xf32>
    %c8_46 = arith.constant 8 : index
    %c256_47 = arith.constant 256 : index
    %93 = vector.load %arg9[%c8_46, %c256_47] : memref<36x512xf32, #tpu.memory_space<vmem>>, vector<4x256xf32>
    tpu.vector_store %arg9[%c8_46, %c256_47], %92 {strides = array<i32>} : memref<36x512xf32, #tpu.memory_space<vmem>>, vector<4x256xf32>,
    %c0_48 = arith.constant 0 : index
    %c127 = arith.constant 127 : index
    %94 = vector.load %arg8[%c0_48, %c127] : memref<8x512xf32, #tpu.memory_space<vmem>>, vector<8x256xf32>
    %c0_i32_49 = arith.constant 0 : i32
    %95 = vector.broadcast %c0_i32_49 : i32 to vector<1x256xi32>
    %96 = arith.addi %8, %95 : vector<1x256xi32>
    %c0_i32_50 = arith.constant 0 : i32
    %97 = vector.broadcast %c0_i32_50 : i32 to vector<1x256xi32>
    %98 = arith.cmpi sge, %96, %97 : vector<1x256xi32>
    %c0_i32_51 = arith.constant 0 : i32
    %99 = vector.broadcast %c0_i32_51 : i32 to vector<1x256xi32>
    %100 = arith.addi %8, %99 : vector<1x256xi32>
    %c16_i32_52 = arith.constant 16 : i32
    %101 = vector.broadcast %c16_i32_52 : i32 to vector<1x256xi32>
    %102 = arith.cmpi slt, %100, %101 : vector<1x256xi32>
    %103 = arith.andi %98, %102 : vector<1x256xi1>
    %c-1_i32_53 = arith.constant -1 : i32
    %104 = vector.broadcast %c-1_i32_53 : i32 to vector<1x256xi32>
    %105 = arith.addi %9, %104 : vector<1x256xi32>
    %c0_i32_54 = arith.constant 0 : i32
    %106 = vector.broadcast %c0_i32_54 : i32 to vector<1x256xi32>
    %107 = arith.cmpi sge, %105, %106 : vector<1x256xi32>
    %108 = arith.andi %103, %107 : vector<1x256xi1>
    %c-1_i32_55 = arith.constant -1 : i32
    %109 = vector.broadcast %c-1_i32_55 : i32 to vector<1x256xi32>
    %110 = arith.addi %9, %109 : vector<1x256xi32>
    %c16_i32_56 = arith.constant 16 : i32
    %111 = vector.broadcast %c16_i32_56 : i32 to vector<1x256xi32>
    %112 = arith.cmpi slt, %110, %111 : vector<1x256xi32>
    %113 = arith.andi %108, %112 : vector<1x256xi1>
    %cst_57 = arith.constant 0.000000e+00 : f32
    %114 = vector.shape_cast %113 : vector<1x256xi1> to vector<1x256xi1>
    %115 = vector.broadcast %114 : vector<1x256xi1> to vector<8x256xi1>
    %116 = vector.broadcast %cst_57 : f32 to vector<8x256xf32>
    %117 = arith.select %115, %94, %116 : vector<8x256xi1>, vector<8x256xf32>
    %118 = vector.extract_strided_slice %117 {offsets = [0, 0], sizes = [4, 256], strides = [1, 1]} : vector<8x256xf32> to vector<4x256xf32>
    %c12 = arith.constant 12 : index
    %c0_58 = arith.constant 0 : index
    %119 = vector.load %arg9[%c12, %c0_58] : memref<36x512xf32, #tpu.memory_space<vmem>>, vector<4x256xf32>
    tpu.vector_store %arg9[%c12, %c0_58], %118 {strides = array<i32>} : memref<36x512xf32, #tpu.memory_space<vmem>>, vector<4x256xf32>,
    %120 = vector.extract_strided_slice %117 {offsets = [4, 0], sizes = [4, 256], strides = [1, 1]} : vector<8x256xf32> to vector<4x256xf32>
    %c12_59 = arith.constant 12 : index
    %c256_60 = arith.constant 256 : index
    %121 = vector.load %arg9[%c12_59, %c256_60] : memref<36x512xf32, #tpu.memory_space<vmem>>, vector<4x256xf32>
    tpu.vector_store %arg9[%c12_59, %c256_60], %120 {strides = array<i32>} : memref<36x512xf32, #tpu.memory_space<vmem>>, vector<4x256xf32>,
    %c0_61 = arith.constant 0 : index
    %c128_62 = arith.constant 128 : index
    %122 = vector.load %arg8[%c0_61, %c128_62] : memref<8x512xf32, #tpu.memory_space<vmem>>, vector<8x256xf32>
    %c0_i32_63 = arith.constant 0 : i32
    %123 = vector.broadcast %c0_i32_63 : i32 to vector<1x256xi32>
    %124 = arith.addi %8, %123 : vector<1x256xi32>
    %c0_i32_64 = arith.constant 0 : i32
    %125 = vector.broadcast %c0_i32_64 : i32 to vector<1x256xi32>
    %126 = arith.cmpi sge, %124, %125 : vector<1x256xi32>
    %c0_i32_65 = arith.constant 0 : i32
    %127 = vector.broadcast %c0_i32_65 : i32 to vector<1x256xi32>
    %128 = arith.addi %8, %127 : vector<1x256xi32>
    %c16_i32_66 = arith.constant 16 : i32
    %129 = vector.broadcast %c16_i32_66 : i32 to vector<1x256xi32>
    %130 = arith.cmpi slt, %128, %129 : vector<1x256xi32>
    %131 = arith.andi %126, %130 : vector<1x256xi1>
    %c0_i32_67 = arith.constant 0 : i32
    %132 = vector.broadcast %c0_i32_67 : i32 to vector<1x256xi32>
    %133 = arith.addi %9, %132 : vector<1x256xi32>
    %c0_i32_68 = arith.constant 0 : i32
    %134 = vector.broadcast %c0_i32_68 : i32 to vector<1x256xi32>
    %135 = arith.cmpi sge, %133, %134 : vector<1x256xi32>
    %136 = arith.andi %131, %135 : vector<1x256xi1>
    %c0_i32_69 = arith.constant 0 : i32
    %137 = vector.broadcast %c0_i32_69 : i32 to vector<1x256xi32>
    %138 = arith.addi %9, %137 : vector<1x256xi32>
    %c16_i32_70 = arith.constant 16 : i32
    %139 = vector.broadcast %c16_i32_70 : i32 to vector<1x256xi32>
    %140 = arith.cmpi slt, %138, %139 : vector<1x256xi32>
    %141 = arith.andi %136, %140 : vector<1x256xi1>
    %cst_71 = arith.constant 0.000000e+00 : f32
    %142 = vector.shape_cast %141 : vector<1x256xi1> to vector<1x256xi1>
    %143 = vector.broadcast %142 : vector<1x256xi1> to vector<8x256xi1>
    %144 = vector.broadcast %cst_71 : f32 to vector<8x256xf32>
    %145 = arith.select %143, %122, %144 : vector<8x256xi1>, vector<8x256xf32>
    %146 = vector.extract_strided_slice %145 {offsets = [0, 0], sizes = [4, 256], strides = [1, 1]} : vector<8x256xf32> to vector<4x256xf32>
    %c16 = arith.constant 16 : index
    %c0_72 = arith.constant 0 : index
    %147 = vector.load %arg9[%c16, %c0_72] : memref<36x512xf32, #tpu.memory_space<vmem>>, vector<4x256xf32>
    tpu.vector_store %arg9[%c16, %c0_72], %146 {strides = array<i32>} : memref<36x512xf32, #tpu.memory_space<vmem>>, vector<4x256xf32>,
    %148 = vector.extract_strided_slice %145 {offsets = [4, 0], sizes = [4, 256], strides = [1, 1]} : vector<8x256xf32> to vector<4x256xf32>
    %c16_73 = arith.constant 16 : index
    %c256_74 = arith.constant 256 : index
    %149 = vector.load %arg9[%c16_73, %c256_74] : memref<36x512xf32, #tpu.memory_space<vmem>>, vector<4x256xf32>
    tpu.vector_store %arg9[%c16_73, %c256_74], %148 {strides = array<i32>} : memref<36x512xf32, #tpu.memory_space<vmem>>, vector<4x256xf32>,
    %c0_75 = arith.constant 0 : index
    %c129 = arith.constant 129 : index
    %150 = vector.load %arg8[%c0_75, %c129] : memref<8x512xf32, #tpu.memory_space<vmem>>, vector<8x256xf32>
    %c0_i32_76 = arith.constant 0 : i32
    %151 = vector.broadcast %c0_i32_76 : i32 to vector<1x256xi32>
    %152 = arith.addi %8, %151 : vector<1x256xi32>
    %c0_i32_77 = arith.constant 0 : i32
    %153 = vector.broadcast %c0_i32_77 : i32 to vector<1x256xi32>
    %154 = arith.cmpi sge, %152, %153 : vector<1x256xi32>
    %c0_i32_78 = arith.constant 0 : i32
    %155 = vector.broadcast %c0_i32_78 : i32 to vector<1x256xi32>
    %156 = arith.addi %8, %155 : vector<1x256xi32>
    %c16_i32_79 = arith.constant 16 : i32
    %157 = vector.broadcast %c16_i32_79 : i32 to vector<1x256xi32>
    %158 = arith.cmpi slt, %156, %157 : vector<1x256xi32>
    %159 = arith.andi %154, %158 : vector<1x256xi1>
    %c1_i32_80 = arith.constant 1 : i32
    %160 = vector.broadcast %c1_i32_80 : i32 to vector<1x256xi32>
    %161 = arith.addi %9, %160 : vector<1x256xi32>
    %c0_i32_81 = arith.constant 0 : i32
    %162 = vector.broadcast %c0_i32_81 : i32 to vector<1x256xi32>
    %163 = arith.cmpi sge, %161, %162 : vector<1x256xi32>
    %164 = arith.andi %159, %163 : vector<1x256xi1>
    %c1_i32_82 = arith.constant 1 : i32
    %165 = vector.broadcast %c1_i32_82 : i32 to vector<1x256xi32>
    %166 = arith.addi %9, %165 : vector<1x256xi32>
    %c16_i32_83 = arith.constant 16 : i32
    %167 = vector.broadcast %c16_i32_83 : i32 to vector<1x256xi32>
    %168 = arith.cmpi slt, %166, %167 : vector<1x256xi32>
    %169 = arith.andi %164, %168 : vector<1x256xi1>
    %cst_84 = arith.constant 0.000000e+00 : f32
    %170 = vector.shape_cast %169 : vector<1x256xi1> to vector<1x256xi1>
    %171 = vector.broadcast %170 : vector<1x256xi1> to vector<8x256xi1>
    %172 = vector.broadcast %cst_84 : f32 to vector<8x256xf32>
    %173 = arith.select %171, %150, %172 : vector<8x256xi1>, vector<8x256xf32>
    %174 = vector.extract_strided_slice %173 {offsets = [0, 0], sizes = [4, 256], strides = [1, 1]} : vector<8x256xf32> to vector<4x256xf32>
    %c20 = arith.constant 20 : index
    %c0_85 = arith.constant 0 : index
    %175 = vector.load %arg9[%c20, %c0_85] : memref<36x512xf32, #tpu.memory_space<vmem>>, vector<4x256xf32>
    tpu.vector_store %arg9[%c20, %c0_85], %174 {strides = array<i32>} : memref<36x512xf32, #tpu.memory_space<vmem>>, vector<4x256xf32>,
    %176 = vector.extract_strided_slice %173 {offsets = [4, 0], sizes = [4, 256], strides = [1, 1]} : vector<8x256xf32> to vector<4x256xf32>
    %c20_86 = arith.constant 20 : index
    %c256_87 = arith.constant 256 : index
    %177 = vector.load %arg9[%c20_86, %c256_87] : memref<36x512xf32, #tpu.memory_space<vmem>>, vector<4x256xf32>
    tpu.vector_store %arg9[%c20_86, %c256_87], %176 {strides = array<i32>} : memref<36x512xf32, #tpu.memory_space<vmem>>, vector<4x256xf32>,
    %c0_88 = arith.constant 0 : index
    %c143 = arith.constant 143 : index
    %178 = vector.load %arg8[%c0_88, %c143] : memref<8x512xf32, #tpu.memory_space<vmem>>, vector<8x256xf32>
    %c1_i32_89 = arith.constant 1 : i32
    %179 = vector.broadcast %c1_i32_89 : i32 to vector<1x256xi32>
    %180 = arith.addi %8, %179 : vector<1x256xi32>
    %c0_i32_90 = arith.constant 0 : i32
    %181 = vector.broadcast %c0_i32_90 : i32 to vector<1x256xi32>
    %182 = arith.cmpi sge, %180, %181 : vector<1x256xi32>
    %c1_i32_91 = arith.constant 1 : i32
    %183 = vector.broadcast %c1_i32_91 : i32 to vector<1x256xi32>
    %184 = arith.addi %8, %183 : vector<1x256xi32>
    %c16_i32_92 = arith.constant 16 : i32
    %185 = vector.broadcast %c16_i32_92 : i32 to vector<1x256xi32>
    %186 = arith.cmpi slt, %184, %185 : vector<1x256xi32>
    %187 = arith.andi %182, %186 : vector<1x256xi1>
    %c-1_i32_93 = arith.constant -1 : i32
    %188 = vector.broadcast %c-1_i32_93 : i32 to vector<1x256xi32>
    %189 = arith.addi %9, %188 : vector<1x256xi32>
    %c0_i32_94 = arith.constant 0 : i32
    %190 = vector.broadcast %c0_i32_94 : i32 to vector<1x256xi32>
    %191 = arith.cmpi sge, %189, %190 : vector<1x256xi32>
    %192 = arith.andi %187, %191 : vector<1x256xi1>
    %c-1_i32_95 = arith.constant -1 : i32
    %193 = vector.broadcast %c-1_i32_95 : i32 to vector<1x256xi32>
    %194 = arith.addi %9, %193 : vector<1x256xi32>
    %c16_i32_96 = arith.constant 16 : i32
    %195 = vector.broadcast %c16_i32_96 : i32 to vector<1x256xi32>
    %196 = arith.cmpi slt, %194, %195 : vector<1x256xi32>
    %197 = arith.andi %192, %196 : vector<1x256xi1>
    %cst_97 = arith.constant 0.000000e+00 : f32
    %198 = vector.shape_cast %197 : vector<1x256xi1> to vector<1x256xi1>
    %199 = vector.broadcast %198 : vector<1x256xi1> to vector<8x256xi1>
    %200 = vector.broadcast %cst_97 : f32 to vector<8x256xf32>
    %201 = arith.select %199, %178, %200 : vector<8x256xi1>, vector<8x256xf32>
    %202 = vector.extract_strided_slice %201 {offsets = [0, 0], sizes = [4, 256], strides = [1, 1]} : vector<8x256xf32> to vector<4x256xf32>
    %c24 = arith.constant 24 : index
    %c0_98 = arith.constant 0 : index
    %203 = vector.load %arg9[%c24, %c0_98] : memref<36x512xf32, #tpu.memory_space<vmem>>, vector<4x256xf32>
    tpu.vector_store %arg9[%c24, %c0_98], %202 {strides = array<i32>} : memref<36x512xf32, #tpu.memory_space<vmem>>, vector<4x256xf32>,
    %204 = vector.extract_strided_slice %201 {offsets = [4, 0], sizes = [4, 256], strides = [1, 1]} : vector<8x256xf32> to vector<4x256xf32>
    %c24_99 = arith.constant 24 : index
    %c256_100 = arith.constant 256 : index
    %205 = vector.load %arg9[%c24_99, %c256_100] : memref<36x512xf32, #tpu.memory_space<vmem>>, vector<4x256xf32>
    tpu.vector_store %arg9[%c24_99, %c256_100], %204 {strides = array<i32>} : memref<36x512xf32, #tpu.memory_space<vmem>>, vector<4x256xf32>,
    %c0_101 = arith.constant 0 : index
    %c144 = arith.constant 144 : index
    %206 = vector.load %arg8[%c0_101, %c144] : memref<8x512xf32, #tpu.memory_space<vmem>>, vector<8x256xf32>
    %c1_i32_102 = arith.constant 1 : i32
    %207 = vector.broadcast %c1_i32_102 : i32 to vector<1x256xi32>
    %208 = arith.addi %8, %207 : vector<1x256xi32>
    %c0_i32_103 = arith.constant 0 : i32
    %209 = vector.broadcast %c0_i32_103 : i32 to vector<1x256xi32>
    %210 = arith.cmpi sge, %208, %209 : vector<1x256xi32>
    %c1_i32_104 = arith.constant 1 : i32
    %211 = vector.broadcast %c1_i32_104 : i32 to vector<1x256xi32>
    %212 = arith.addi %8, %211 : vector<1x256xi32>
    %c16_i32_105 = arith.constant 16 : i32
    %213 = vector.broadcast %c16_i32_105 : i32 to vector<1x256xi32>
    %214 = arith.cmpi slt, %212, %213 : vector<1x256xi32>
    %215 = arith.andi %210, %214 : vector<1x256xi1>
    %c0_i32_106 = arith.constant 0 : i32
    %216 = vector.broadcast %c0_i32_106 : i32 to vector<1x256xi32>
    %217 = arith.addi %9, %216 : vector<1x256xi32>
    %c0_i32_107 = arith.constant 0 : i32
    %218 = vector.broadcast %c0_i32_107 : i32 to vector<1x256xi32>
    %219 = arith.cmpi sge, %217, %218 : vector<1x256xi32>
    %220 = arith.andi %215, %219 : vector<1x256xi1>
    %c0_i32_108 = arith.constant 0 : i32
    %221 = vector.broadcast %c0_i32_108 : i32 to vector<1x256xi32>
    %222 = arith.addi %9, %221 : vector<1x256xi32>
    %c16_i32_109 = arith.constant 16 : i32
    %223 = vector.broadcast %c16_i32_109 : i32 to vector<1x256xi32>
    %224 = arith.cmpi slt, %222, %223 : vector<1x256xi32>
    %225 = arith.andi %220, %224 : vector<1x256xi1>
    %cst_110 = arith.constant 0.000000e+00 : f32
    %226 = vector.shape_cast %225 : vector<1x256xi1> to vector<1x256xi1>
    %227 = vector.broadcast %226 : vector<1x256xi1> to vector<8x256xi1>
    %228 = vector.broadcast %cst_110 : f32 to vector<8x256xf32>
    %229 = arith.select %227, %206, %228 : vector<8x256xi1>, vector<8x256xf32>
    %230 = vector.extract_strided_slice %229 {offsets = [0, 0], sizes = [4, 256], strides = [1, 1]} : vector<8x256xf32> to vector<4x256xf32>
    %c28 = arith.constant 28 : index
    %c0_111 = arith.constant 0 : index
    %231 = vector.load %arg9[%c28, %c0_111] : memref<36x512xf32, #tpu.memory_space<vmem>>, vector<4x256xf32>
    tpu.vector_store %arg9[%c28, %c0_111], %230 {strides = array<i32>} : memref<36x512xf32, #tpu.memory_space<vmem>>, vector<4x256xf32>,
    %232 = vector.extract_strided_slice %229 {offsets = [4, 0], sizes = [4, 256], strides = [1, 1]} : vector<8x256xf32> to vector<4x256xf32>
    %c28_112 = arith.constant 28 : index
    %c256_113 = arith.constant 256 : index
    %233 = vector.load %arg9[%c28_112, %c256_113] : memref<36x512xf32, #tpu.memory_space<vmem>>, vector<4x256xf32>
    tpu.vector_store %arg9[%c28_112, %c256_113], %232 {strides = array<i32>} : memref<36x512xf32, #tpu.memory_space<vmem>>, vector<4x256xf32>,
    %c0_114 = arith.constant 0 : index
    %c145 = arith.constant 145 : index
    %234 = vector.load %arg8[%c0_114, %c145] : memref<8x512xf32, #tpu.memory_space<vmem>>, vector<8x256xf32>
    %c1_i32_115 = arith.constant 1 : i32
    %235 = vector.broadcast %c1_i32_115 : i32 to vector<1x256xi32>
    %236 = arith.addi %8, %235 : vector<1x256xi32>
    %c0_i32_116 = arith.constant 0 : i32
    %237 = vector.broadcast %c0_i32_116 : i32 to vector<1x256xi32>
    %238 = arith.cmpi sge, %236, %237 : vector<1x256xi32>
    %c1_i32_117 = arith.constant 1 : i32
    %239 = vector.broadcast %c1_i32_117 : i32 to vector<1x256xi32>
    %240 = arith.addi %8, %239 : vector<1x256xi32>
    %c16_i32_118 = arith.constant 16 : i32
    %241 = vector.broadcast %c16_i32_118 : i32 to vector<1x256xi32>
    %242 = arith.cmpi slt, %240, %241 : vector<1x256xi32>
    %243 = arith.andi %238, %242 : vector<1x256xi1>
    %c1_i32_119 = arith.constant 1 : i32
    %244 = vector.broadcast %c1_i32_119 : i32 to vector<1x256xi32>
    %245 = arith.addi %9, %244 : vector<1x256xi32>
    %c0_i32_120 = arith.constant 0 : i32
    %246 = vector.broadcast %c0_i32_120 : i32 to vector<1x256xi32>
    %247 = arith.cmpi sge, %245, %246 : vector<1x256xi32>
    %248 = arith.andi %243, %247 : vector<1x256xi1>
    %c1_i32_121 = arith.constant 1 : i32
    %249 = vector.broadcast %c1_i32_121 : i32 to vector<1x256xi32>
    %250 = arith.addi %9, %249 : vector<1x256xi32>
    %c16_i32_122 = arith.constant 16 : i32
    %251 = vector.broadcast %c16_i32_122 : i32 to vector<1x256xi32>
    %252 = arith.cmpi slt, %250, %251 : vector<1x256xi32>
    %253 = arith.andi %248, %252 : vector<1x256xi1>
    %cst_123 = arith.constant 0.000000e+00 : f32
    %254 = vector.shape_cast %253 : vector<1x256xi1> to vector<1x256xi1>
    %255 = vector.broadcast %254 : vector<1x256xi1> to vector<8x256xi1>
    %256 = vector.broadcast %cst_123 : f32 to vector<8x256xf32>
    %257 = arith.select %255, %234, %256 : vector<8x256xi1>, vector<8x256xf32>
    %258 = vector.extract_strided_slice %257 {offsets = [0, 0], sizes = [4, 256], strides = [1, 1]} : vector<8x256xf32> to vector<4x256xf32>
    %c32 = arith.constant 32 : index
    %c0_124 = arith.constant 0 : index
    %259 = vector.load %arg9[%c32, %c0_124] : memref<36x512xf32, #tpu.memory_space<vmem>>, vector<4x256xf32>
    tpu.vector_store %arg9[%c32, %c0_124], %258 {strides = array<i32>} : memref<36x512xf32, #tpu.memory_space<vmem>>, vector<4x256xf32>,
    %260 = vector.extract_strided_slice %257 {offsets = [4, 0], sizes = [4, 256], strides = [1, 1]} : vector<8x256xf32> to vector<4x256xf32>
    %c32_125 = arith.constant 32 : index
    %c256_126 = arith.constant 256 : index
    %261 = vector.load %arg9[%c32_125, %c256_126] : memref<36x512xf32, #tpu.memory_space<vmem>>, vector<4x256xf32>
    tpu.vector_store %arg9[%c32_125, %c256_126], %260 {strides = array<i32>} : memref<36x512xf32, #tpu.memory_space<vmem>>, vector<4x256xf32>,
    %c0_127 = arith.constant 0 : index
    %c0_128 = arith.constant 0 : index
    %262 = vector.load %arg3[%c0_127, %c0_128] : memref<2x36xf32, #tpu.memory_space<vmem>>, vector<2x36xf32>
    %c0_129 = arith.constant 0 : index
    %c0_130 = arith.constant 0 : index
    %263 = vector.load %arg9[%c0_129, %c0_130] : memref<36x512xf32, #tpu.memory_space<vmem>>, vector<36x512xf32>
    %cst_131 = arith.constant dense<0.000000e+00> : vector<2x512xf32>
    %264 = tpu.matmul %262, %263, %cst_131 {dimension_numbers = #tpu.dot_dimension_numbers<[1], [0], [0], [1], [0, 0, 1, 1], [], []>} : vector<2x36xf32>, vector<36x512xf32>, vector<2x512xf32> -> vector<2x512xf32>
    %c0_132 = arith.constant 0 : index
    %c0_133 = arith.constant 0 : index
    %265 = vector.load %arg4[%c0_132, %c0_133] : memref<2x1xf32, #tpu.memory_space<vmem>>, vector<2x1xf32>
    %266 = vector.broadcast %265 : vector<2x1xf32> to vector<2x512xf32>
    %267 = arith.addf %264, %266 : vector<2x512xf32>
    %cst_134 = arith.constant 0.000000e+00 : f32
    %268 = vector.broadcast %cst_134 : f32 to vector<2x512xf32>
    %269 = arith.maximumf %267, %268 : vector<2x512xf32>
    %c0_135 = arith.constant 0 : index
    %c0_136 = arith.constant 0 : index
    %270 = vector.load %arg5[%c0_135, %c0_136] : memref<8x2xf32, #tpu.memory_space<vmem>>, vector<8x2xf32>
    %cst_137 = arith.constant dense<0.000000e+00> : vector<8x512xf32>
    %271 = tpu.matmul %270, %269, %cst_137 {dimension_numbers = #tpu.dot_dimension_numbers<[1], [0], [0], [1], [0, 0, 1, 1], [], []>} : vector<8x2xf32>, vector<2x512xf32>, vector<8x512xf32> -> vector<8x512xf32>
    %c0_138 = arith.constant 0 : index
    %c0_139 = arith.constant 0 : index
    %272 = vector.load %arg6[%c0_138, %c0_139] : memref<8x1xf32, #tpu.memory_space<vmem>>, vector<8x1xf32>
    %273 = vector.broadcast %272 : vector<8x1xf32> to vector<8x512xf32>
    %274 = arith.addf %271, %273 : vector<8x512xf32>
    %275 = vector.extract_strided_slice %274 {offsets = [0, 0], sizes = [8, 256], strides = [1, 1]} : vector<8x512xf32> to vector<8x256xf32>
    %c0_140 = arith.constant 0 : index
    %c0_141 = arith.constant 0 : index
    %c0_142 = arith.constant 0 : index
    %276 = vector.load %arg7[%c0_140, %c0_141, %c0_142] : memref<2x8x256xf32, #tpu.memory_space<vmem>>, vector<1x8x256xf32>
    %277 = vector.shape_cast %276 : vector<1x8x256xf32> to vector<8x256xf32>
    %278 = vector.shape_cast %275 : vector<8x256xf32> to vector<1x8x256xf32>
    tpu.vector_store %arg7[%c0_140, %c0_141, %c0_142], %278 {strides = array<i32>} : memref<2x8x256xf32, #tpu.memory_space<vmem>>, vector<1x8x256xf32>,
    %279 = vector.extract_strided_slice %274 {offsets = [0, 256], sizes = [8, 256], strides = [1, 1]} : vector<8x512xf32> to vector<8x256xf32>
    %c1_143 = arith.constant 1 : index
    %c0_144 = arith.constant 0 : index
    %c0_145 = arith.constant 0 : index
    %280 = vector.load %arg7[%c1_143, %c0_144, %c0_145] : memref<2x8x256xf32, #tpu.memory_space<vmem>>, vector<1x8x256xf32>
    %281 = vector.shape_cast %280 : vector<1x8x256xf32> to vector<8x256xf32>
    %282 = vector.shape_cast %279 : vector<8x256xf32> to vector<1x8x256xf32>
    tpu.vector_store %arg7[%c1_143, %c0_144, %c0_145], %282 {strides = array<i32>} : memref<2x8x256xf32, #tpu.memory_space<vmem>>, vector<1x8x256xf32>,
    return
  }
  func.func @transform_0(%arg0: i32) -> (i32, i32, i32) {
    %c0_i32 = arith.constant 0 : i32
    %c0_i32_0 = arith.constant 0 : i32
    %c0_i32_1 = arith.constant 0 : i32
    return %arg0, %c0_i32, %c0_i32_0 : i32, i32, i32
  }
  func.func @transform_1(%arg0: i32) -> (i32, i32) {
    %c0_i32 = arith.constant 0 : i32
    %c0_i32_0 = arith.constant 0 : i32
    %c0_i32_1 = arith.constant 0 : i32
    return %c0_i32, %c0_i32_0 : i32, i32
  }
  func.func @transform_2(%arg0: i32) -> (i32, i32) {
    %c0_i32 = arith.constant 0 : i32
    %c0_i32_0 = arith.constant 0 : i32
    %c0_i32_1 = arith.constant 0 : i32
    return %c0_i32, %c0_i32_0 : i32, i32
  }
  func.func @transform_3(%arg0: i32) -> (i32, i32) {
    %c0_i32 = arith.constant 0 : i32
    %c0_i32_0 = arith.constant 0 : i32
    %c0_i32_1 = arith.constant 0 : i32
    return %c0_i32, %c0_i32_0 : i32, i32
  }
  func.func @transform_4(%arg0: i32) -> (i32, i32) {
    %c0_i32 = arith.constant 0 : i32
    %c0_i32_0 = arith.constant 0 : i32
    %c0_i32_1 = arith.constant 0 : i32
    return %c0_i32, %c0_i32_0 : i32, i32
  }
  func.func @transform_5(%arg0: i32) -> (i32, i32) {
    %c0_i32 = arith.constant 0 : i32
    %c0_i32_0 = arith.constant 0 : i32
    %c0_i32_1 = arith.constant 0 : i32
    return %c0_i32, %c0_i32_0 : i32, i32
  }
  func.func @transform_6(%arg0: i32) -> (i32, i32, i32) {
    %c0_i32 = arith.constant 0 : i32
    %c0_i32_0 = arith.constant 0 : i32
    %c0_i32_1 = arith.constant 0 : i32
    return %arg0, %c0_i32, %c0_i32_0 : i32, i32, i32
  }
}

</mosaic_0001>

<bundles_post_ra>
// kernel: tpu_custom_call.1
= control target key start
LH: loop header
LB: loop body
LE: loop exit
PB: predicated region body
PF: predicated region fallthrough
CT: control target
= control target key end

     0   :  { %v57_v2 = vlaneseq  ;;  %v855_v3 = vmov 0.0   ;;  %s856_s25 = smov 111   ;;  %v857_v8 = vmov 0   ;;  %s1180_s0 = inlined_call_operand.vmem [shape: f32[2,4,256], index: 0, kind: input, shape index: {}]   ;;  %s1181_s1 = inlined_call_operand.vmem [shape: s32[2,256], index: 1, kind: input, shape index: {}]   ;;  %s1182_s2 = inlined_call_operand.vmem [shape: f32[2,36], index: 2, kind: input, shape index: {}]   ;;  %s1183_s3 = inlined_call_operand.vmem [shape: f32[2,1], index: 3, kind: input, shape index: {}]   ;;  %s1184_s4 = inlined_call_operand.vmem [shape: f32[8,2], index: 4, kind: input, shape index: {}]   ;;  %s1185_s5 = inlined_call_operand.vmem [shape: f32[8,1], index: 5, kind: input, shape index: {}]   ;;  %s1186_s6 = inlined_call_operand.hbm [shape: f32[2,8,256], index: 6, kind: output, shape index: {}]  }
   0x1   :  { %v28_v0 = vld [vmem:[%s1180_s0] sm:$0xff]  ;;  %v803_v1 = vld [vmem:[%s1180_s0 + $0x8] sm:$0xff]  ;;  %407 = vrot.lane.b32.xlu0 %v855_v3, %s856_s25  ;;  %25 = vst [vmem:[#allocation2] sm:$0xff] %v855_v3  ;;  %26 = vst [vmem:[#allocation2 + $0x18] sm:$0xff] %v855_v3  ;;  %605 = vmatprep.mubr.f32.mxu1 %v855_v3 }
   0x2   :  { %v30_v4 = vcombine.high %v28_v0, %v28_v0  ;;  %v37_v5 = vcombine.low %v803_v1, %v803_v1  ;;  %v41_v6 = vld [vmem:[%s1181_s1] ss:$2 sm:$0x3]  ;;  %32 = vst [vmem:[#allocation2] sm:$0xf] %v28_v0  ;;  %534 = vmatprep.mubr.f32.mxu0 %v855_v3  ;;  %829 = vset.pattern.permute.xlu0 %v857_v8  ;;  %v58_v12 = vshrl.u32 %v57_v2, 7 }
   0x3   :  { %40 = vst [vmem:[#allocation2 + $0x18] sm:$0xf0] %v803_v1  ;;  %v919_v7 = vld [vmem:[%s1181_s1 + $0x1] ss:$2 sm:$0x3]  ;;  %v299_v10 = vadd.s32 1, %v41_v6  ;;  %830 = vset.pattern.permute.xlu1 %v857_v8 }
   0x4   :  { %39 = vst [vmem:[#allocation2] sm:$0xf0] %v37_v5  ;;  %33 = vst [vmem:[#allocation2 + $0x18] sm:$0xf] %v30_v4  ;;  %v924_v9 = vadd.s32 4294967295, %v919_v7  ;;  %v927_v11 = vadd.s32 1, %v919_v7 }
   0x5   :  { %11 = vsyncpa [#allocation5], 0  ;;  %s858_s1 = smov 113   ;;  %vm300_vm2 = vcmp.ge.s32.totalorder %v299_v10, 0  ;;  %vm301_vm3 = vcmp.lt.s32.totalorder %v299_v10, 16  ;;  %v944_v14 = vsub.s32 1, %v58_v12 }
   0x6   :  { %323 = vrot.lane.b32.xlu0 %v855_v3, %s858_s1  ;;  %vm52_vm0 = vcmp.ge.s32.totalorder %v924_v9, 0  ;;  %vm54_vm1 = vcmp.lt.s32.totalorder %v924_v9, 16  ;;  %vm934_vm4 = vmand %vm300_vm2, %vm301_vm3  ;;  %vm141_vm5 = vcmp.ge.s32.totalorder %v927_v11, 0  ;;  %vm143_vm7 = vcmp.lt.s32.totalorder %v927_v11, 16  ;;  %s859_s29 = smov 112   ;;  %s860_s30 = smov 127  }
   0x7   :  { %vm303_vm6 = vmand %vm934_vm4, %vm52_vm0  ;;  %v948_v15 = vsub.s32 0, %v58_v12  ;;  %vm96_vm9 = vcmp.ge.s32.totalorder %v919_v7, 0  ;;  %vm98_vm11 = vcmp.lt.s32.totalorder %v919_v7, 16  ;;  %vm185_vm13 = vcmp.ge.s32.totalorder %v41_v6, 0  ;;  %s861_s7 = smov 15   ;;  %s862_s8 = smov 1  }
   0x8   :  { %vm304_vm8 = vmand %vm303_vm6, %vm54_vm1  ;;  %vm186_vm14 = vcmp.lt.s32.totalorder %v41_v6, 16  ;;  %v47_v26 = vadd.s32 4294967295, %v41_v6  ;;  %s863_s9 = smov 17   ;;  %s864_s10 = smov 16   ;;  %v447_v52 = vld [vmem:[%s1183_s3] sm:$0x3] }
   0x9   :  { %v952_v16 = vsel %vm304_vm8, 1, %v857_v8  ;;  %vm387_vm10 = vmand %vm934_vm4, %vm141_vm5 }
   0xa   :  { %v313_v19 = vrot.slane %v952_v16, %v944_v14  ;;  %vm388_vm12 = vmand %vm387_vm10, %vm143_vm7  ;;  %v309_v20 = vrot.slane %v952_v16, %v948_v15  ;;  %vm48_vm8 = vcmp.ge.s32.totalorder %v47_v26, 0  ;;  %vm49_vm10 = vcmp.lt.s32.totalorder %v47_v26, 16 }
   0xb   :  { %v959_v17 = vld [vmem:[#allocation2] sm:$0xff]  ;;  %v961_v18 = vld [vmem:[#allocation2 + $0x18] sm:$0xff]  ;;  %v974_v21 = vsel %vm388_vm12, 1, %v857_v8  ;;  %vm345_vm15 = vmand %vm934_vm4, %vm96_vm9 }
   0xc   :  { %403 = vrot.lane.b32.xlu1 %v959_v17, %s856_s25  ;;  %405 = vrot.lane.b32.xlu0 %v961_v18, %s856_s25  ;;  %v393_v22 = vrot.slane %v974_v21, %v948_v15  ;;  %v397_v23 = vrot.slane %v974_v21, %v944_v14  ;;  %vm346_vm2 = vmand %vm345_vm15, %vm98_vm11 }
   0xd   :  { %v987_v24 = vsel %vm346_vm2, 1, %v857_v8  ;;  %vm989_vm3 = vmand %vm185_vm13, %vm186_vm14 }
   0xe   :  { %v355_v27 = vrot.slane %v987_v24, %v944_v14  ;;  %v351_v28 = vrot.slane %v987_v24, %v948_v15  ;;  %vm229_vm4 = vmand %vm989_vm3, %vm96_vm9 }
   0xf   :  { %vm230_vm6 = vmand %vm229_vm4, %vm98_vm11 }
  0x10   :  { %321 = vrot.lane.b32.xlu1 %v961_v18, %s858_s1  ;;  %365 = vrot.lane.b32.xlu0 %v855_v3, %s859_s29  ;;  %v231_v29 = vsel %vm230_vm6, 1, %v857_v8  ;;  %vm257_vm12 = vmand %vm989_vm3, %vm141_vm5 }
  0x11   :  { %v235_v30 = vrot.slane %v231_v29, %v948_v15  ;;  %v239_v31 = vrot.slane %v231_v29, %v944_v14  ;;  %vm258_vm13 = vmand %vm257_vm12, %vm143_vm7  ;;  %vm325_vm12 = vcmask 924672  }
  0x12   :  { %v1016_v32 = vsel %vm258_vm13, 1, %v857_v8  ;;  %vm1018_vm14 = vmand %vm48_vm8, %vm49_vm10  ;;  %vm399_vm10 = vcmp.eq.s32.totalorder %v397_v23, 1  ;;  %vm315_vm13 = vcmp.eq.s32.totalorder %v313_v19, 1 }
  0x13   :  { %vm240_vm15 = vcmp.eq.s32.totalorder %v235_v30, 1  ;;  %vm241_vm2 = vcmp.eq.s32.totalorder %v239_v31, 1  ;;  %v267_v34 = vrot.slane %v1016_v32, %v944_v14  ;;  %v263_v35 = vrot.slane %v1016_v32, %v948_v15  ;;  %vm142_vm4 = vmand %vm1018_vm14, %vm141_vm5 }
  0x14   :  { %363 = vrot.lane.b32.xlu1 %v961_v18, %s859_s29  ;;  %361 = vrot.lane.b32.xlu0 %v959_v17, %s859_s29  ;;  %v243_v36 = vsel %vm241_vm2, %v961_v18, 0.0  ;;  %v242_v37 = vsel %vm240_vm15, %v959_v17, 0.0  ;;  %vm144_vm6 = vmand %vm142_vm4, %vm143_vm7  ;;  %vm357_vm15 = vcmp.eq.s32.totalorder %v355_v27, 1  ;;  %vm356_vm2 = vcmp.eq.s32.totalorder %v351_v28, 1 }
  0x15   :  { %245 = vst [vmem:[#allocation3 + $0x88] sm:$0xf] %v243_v36  ;;  %v249_v38 = vrot.slane %v243_v36, 4  ;;  %244 = vst [vmem:[#allocation3 + $0x8] sm:$0xf] %v242_v37  ;;  %v248_v39 = vrot.slane %v242_v37, 4 }
  0x16   :  { %vm188_vm8 = vmand %vm989_vm3, %vm52_vm0  ;;  %v1041_v40 = vsel %vm144_vm6, 1, %v857_v8  ;;  %vm457_vm4 = vcmask 1043456   ;;  %vm314_vm6 = vcmp.eq.s32.totalorder %v309_v20, 1 }
  0x17   :  { %vm189_vm5 = vmand %vm188_vm8, %vm54_vm1  ;;  %253 = vst [vmem:[#allocation3 + $0x40] sm:$0xf] %v249_v38  ;;  %v153_v41 = vrot.slane %v1041_v40, %v944_v14  ;;  %v149_v43 = vrot.slane %v1041_v40, %v948_v15  ;;  %vm279_vm8 = vcmask 1039360  }
  0x18   :  { %319 = vrot.lane.b32.xlu1 %v959_v17, %s858_s1  ;;  %277 = vrot.lane.b32.xlu0 %v855_v3, %s860_s30  ;;  %252 = vst [vmem:[#allocation3 + $0x28] sm:$0xf] %v248_v39  ;;  %v1051_v42 = vsel %vm189_vm5, 1, %v857_v8  ;;  %vm53_vm7 = vmand %vm1018_vm14, %vm52_vm0  ;;  %vm269_vm5 = vcmp.eq.s32.totalorder %v267_v34, 1 }
  0x19   :  { %v198_v44 = vrot.slane %v1051_v42, %v944_v14  ;;  %v194_v45 = vrot.slane %v1051_v42, %v948_v15  ;;  %vm55_vm3 = vmand %vm53_vm7, %vm54_vm1  ;;  %vm268_vm7 = vcmp.eq.s32.totalorder %v263_v35, 1 }
  0x1a   :  { %v1070_v46 = vsel %vm55_vm3, 1, %v857_v8  ;;  %vm97_vm0 = vmand %vm1018_vm14, %vm96_vm9  ;;  %vm409_vm9 = vcmask 908288   ;;  %vm367_vm14 = vcmask 916480   ;;  %vm165_vm3 = vcmask 121856  }
  0x1b   :  { %v64_v47 = vrot.slane %v1070_v46, %v944_v14  ;;  %v60_v48 = vrot.slane %v1070_v46, %v948_v15  ;;  %vm99_vm1 = vmand %vm97_vm0, %vm98_vm11  ;;  %vm398_vm11 = vcmp.eq.s32.totalorder %v393_v22, 1  ;;  %vm155_vm0 = vcmp.eq.s32.totalorder %v153_v41, 1 }
  0x1c   :  { %275 = vrot.lane.b32.xlu1 %v961_v18, %s860_s30  ;;  %161 = vrot.lane.b32.xlu0 %v959_v17, %s861_s7  ;;  %v1085_v49 = vsel %vm99_vm1, 1, %v857_v8  ;;  %vm154_vm1 = vcmp.eq.s32.totalorder %v149_v43, 1 }
  0x1d   :  { %v108_v50 = vrot.slane %v1085_v49, %v944_v14  ;;  %v104_v51 = vrot.slane %v1085_v49, %v948_v15 }
  0x20   :  { %273 = vrot.lane.b32.xlu1 %v959_v17, %s860_s30  ;;  %206 = vrot.lane.b32.xlu0 %v959_v17, %s862_s8 }
  0x24   :  { %163 = vrot.lane.b32.xlu1 %v961_v18, %s861_s7  ;;  %159 = vrot.lane.b32.xlu0 %v855_v3, %s861_s7 }
  0x28   :  { %208 = vrot.lane.b32.xlu1 %v961_v18, %s862_s8  ;;  %72 = vrot.lane.b32.xlu0 %v959_v17, %s863_s9 }
  0x2c   :  { %204 = vrot.lane.b32.xlu1 %v855_v3, %s862_s8  ;;  %116 = vrot.lane.b32.xlu0 %v959_v17, %s864_s10 }
  0x30   :  { %74 = vrot.lane.b32.xlu1 %v961_v18, %s863_s9  ;;  %70 = vrot.lane.b32.xlu0 %v855_v3, %s863_s9 }
  0x34   :  { %118 = vrot.lane.b32.xlu1 %v961_v18, %s864_s10  ;;  %450 = vperm.xlu0 %829, %v447_v52  }
  0x38   :  { %114 = vrot.lane.b32.xlu1 %v855_v3, %s864_s10 }
  0x73   :  { %v408_v53 = vpop.permute.xlu0 %407 }
  0x78   :  { %v324_v54 = vpop.permute.xlu0 %323 }
  0x7e   :  { %v404_v55 = vpop.permute.xlu1 %403  ;;  %v406_v56 = vpop.permute.xlu0 %405 }
  0x7f   :  { %v410_v57 = vsel %vm409_vm9, %v404_v55, %v406_v56  ;;  %v411_v58 = vsel %vm409_vm9, %v406_v56, %v408_v53  ;;  %vm210_vm9 = vcmask 7168  }
  0x80   :  { %v414_v59 = vsel %vm398_vm11, %v410_v57, 0.0  ;;  %v415_v60 = vsel %vm399_vm10, %v411_v58, 0.0  ;;  %vm200_vm11 = vcmp.eq.s32.totalorder %v198_v44, 1  ;;  %vm199_vm10 = vcmp.eq.s32.totalorder %v194_v45, 1 }
  0x81   :  { %416 = vst [vmem:[#allocation3 + $0x20] sm:$0xf] %v414_v59  ;;  %417 = vst [vmem:[#allocation3 + $0x48] sm:$0xf] %v415_v60  ;;  %v420_v61 = vrot.slane %v414_v59, 4  ;;  %v421_v62 = vrot.slane %v415_v60, 4 }
  0x82   :  { %v322_v63 = vpop.permute.xlu1 %321  ;;  %v366_v0 = vpop.permute.xlu0 %365 }
  0x83   :  { %v327_v1 = vsel %vm325_vm12, %v322_v63, %v324_v54  ;;  %424 = vst [vmem:[#allocation3 + $0x70] sm:$0xf] %v420_v61  ;;  %425 = vst [vmem:[#allocation3 + $0x90] sm:$0xf] %v421_v62 }
  0x84   :  { %v331_v2 = vsel %vm315_vm13, %v327_v1, 0.0  ;;  %vm66_vm13 = vcmp.eq.s32.totalorder %v64_v47, 1 }
  0x85   :  { %333 = vst [vmem:[#allocation3 + $0x10] sm:$0xf] %v331_v2  ;;  %v337_v4 = vrot.slane %v331_v2, 4 }
  0x86   :  { %v364_v5 = vpop.permute.xlu1 %363  ;;  %v362_v6 = vpop.permute.xlu0 %361 }
  0x87   :  { %341 = vst [vmem:[#allocation3 + $0x60] sm:$0xf] %v337_v4  ;;  %v369_v7 = vsel %vm367_vm14, %v364_v5, %v366_v0  ;;  %v368_v8 = vsel %vm367_vm14, %v362_v6, %v364_v5  ;;  %vm65_vm14 = vcmp.eq.s32.totalorder %v60_v48, 1 }
  0x88   :  { %v373_v9 = vsel %vm357_vm15, %v369_v7, 0.0  ;;  %v372_v10 = vsel %vm356_vm2, %v368_v8, 0.0  ;;  %v444_v11 = vld [vmem:[#allocation3 + $0x48] sm:$0xf]  ;;  %v443_v12 = vld [vmem:[#allocation3 + $0x20] sm:$0xf] }
  0x89   :  { %v377_v13 = vrot.slane %v373_v9, 4  ;;  %383 = vst [vmem:[#allocation3 + $0x60] sm:$0xf0] %v373_v9  ;;  %v376_v17 = vrot.slane %v372_v10, 4  ;;  %382 = vst [vmem:[#allocation3 + $0x98] sm:$0xf0] %v372_v10  ;;  %805 = vmatprep.subr.msk.mxu0 %vm457_vm4, %v444_v11 }
  0x8a   :  { %v320_v18 = vpop.permute.xlu1 %319  ;;  %806 = vmatpush1.msk.msra.mxu0 %vm457_vm4, %v443_v12  ;;  %v278_v19 = vpop.permute.xlu0 %277  ;;  %v446_v21 = vld [vmem:[#allocation3 + $0x90] sm:$0xf]  ;;  %vm120_vm15 = vcmask 130048   ;;  %vm110_vm2 = vcmp.eq.s32.totalorder %v108_v50, 1 }
  0x8b   :  { %v445_v22 = vld [vmem:[#allocation3 + $0x70] sm:$0xf]  ;;  %381 = vst [vmem:[#allocation3 + $0x10] sm:$0xf0] %v377_v13  ;;  %v326_v23 = vsel %vm325_vm12, %v320_v18, %v322_v63  ;;  %380 = vst [vmem:[#allocation3 + $0x58] sm:$0xf0] %v376_v17  ;;  %808 = vmatprep.subr.msk.mxu1 %vm457_vm4, %v446_v21 }
  0x8c   :  { %v330_v24 = vsel %vm314_vm6, %v326_v23, 0.0  ;;  %809 = vmatpush1.msk.msra.mxu1 %vm457_vm4, %v445_v22  ;;  %vm76_vm12 = vcmask 138240   ;;  %vm109_vm4 = vcmp.eq.s32.totalorder %v104_v51, 1  ;;  %vm453_vm6 = vcmask 293888   ;;  %v617_v51 = vld [vmem:[%s1185_s5] sm:$0xff]  ;;  %s865_s5 = smov [#allocation4]  }
  0x8d   :  { %332 = vst [vmem:[#allocation3 + $0x58] sm:$0xf] %v330_v24  ;;  %v336_v16 = vrot.slane %v330_v24, 4  ;;  %v426_v24 = vld [vmem:[%s1182_s2] sm:$0x3]  ;;  %620 = vperm.xlu1 %830, %v617_v51   ;;  %s792_s17 = sshll.u32 %s865_s5, 4  ;;  %s793_s17 = int_to_ptr.vmem [resolvable:$true] %s792_s17 }
  0x8e   :  { %v276_v20 = vpop.permute.xlu1 %275  ;;  %v162_v25 = vpop.permute.xlu0 %161  ;;  %p838_p1 = scmp.lt.s32.totalorder %s793_s17, %s793_s17 }
  0x8f   :  { %340 = vst [vmem:[#allocation3 + $0x98] sm:$0xf] %v336_v16  ;;  %v281_v26 = vsel %vm279_vm8, %v276_v20, %v278_v19 }
  0x90   :  { %v285_v27 = vsel %vm269_vm5, %v281_v26, 0.0  ;;  %v442_v28 = vld [vmem:[#allocation3 + $0x60] sm:$0xff]  ;;  %vm623_vm5 = vcmask 15360  }
  0x91   :  { %v289_v29 = vrot.slane %v285_v27, 4  ;;  %295 = vst [vmem:[#allocation3 + $0x40] sm:$0xf0] %v285_v27  ;;  %565 = vmatprep.subr.mxu1 %v442_v28 }
  0x92   :  { %v274_v30 = vpop.permute.xlu1 %273  ;;  %v440_v31 = vld [vmem:[#allocation3 + $0x10] sm:$0xff]  ;;  %v207_v33 = vpop.permute.xlu0 %206 }
  0x93   :  { %293 = vst [vmem:[#allocation3 + $0x88] sm:$0xf0] %v289_v29  ;;  %v280_v34 = vsel %vm279_vm8, %v274_v30, %v276_v20  ;;  %494 = vmatprep.subr.mxu0 %v440_v31  ;;  %vm627_vm8 = vcmask 1041408  }
  0x94   :  { %v284_v36 = vsel %vm268_vm7, %v280_v34, 0.0  ;;  %v439_v37 = vld [vmem:[#allocation3 + $0x58] sm:$0xff] }
  0x95   :  { %v288_v38 = vrot.slane %v284_v36, 4  ;;  %294 = vst [vmem:[#allocation3 + $0x28] sm:$0xf0] %v284_v36  ;;  %495 = vmatpush1.msra.mxu0 %v439_v37 }
  0x96   :  { %v164_v32 = vpop.permute.xlu1 %163  ;;  %v441_v35 = vld [vmem:[#allocation3 + $0x98] sm:$0xff]  ;;  %v160_v39 = vpop.permute.xlu0 %159 }
  0x97   :  { %292 = vst [vmem:[#allocation3 + $0x8] sm:$0xf0] %v288_v38  ;;  %v167_v52 = vsel %vm165_vm3, %v162_v25, %v164_v32  ;;  %566 = vmatpush1.msra.mxu1 %v441_v35  ;;  %v166_v53 = vsel %vm165_vm3, %v160_v39, %v162_v25 }
  0x98   :  { %v171_v54 = vsel %vm155_vm0, %v167_v52, 0.0  ;;  %v438_v55 = vld [vmem:[#allocation3 + $0x40] sm:$0xff]  ;;  %v170_v56 = vsel %vm154_vm1, %v166_v53, 0.0 }
  0x99   :  { %173 = vst [vmem:[#allocation3 + $0x68] sm:$0xf] %v171_v54  ;;  %v177_v57 = vrot.slane %v171_v54, 4  ;;  %567 = vmatprep.subr.mxu1 %v438_v55  ;;  %172 = vst [vmem:[#allocation3 + $0x30] sm:$0xf] %v170_v56  ;;  %v176_v40 = vrot.slane %v170_v56, 4 }
  0x9a   :  { %v209_v41 = vpop.permute.xlu1 %208  ;;  %v436_v43 = vld [vmem:[#allocation3 + $0x88] sm:$0xff]  ;;  %v73_v58 = vpop.permute.xlu0 %72 }
  0x9b   :  { %181 = vst [vmem:[#allocation3 + $0x80] sm:$0xf] %v177_v57  ;;  %v212_v59 = vsel %vm210_vm9, %v207_v33, %v209_v41  ;;  %180 = vst [vmem:[#allocation3 + $0x78] sm:$0xf] %v176_v40  ;;  %496 = vmatprep.subr.mxu0 %v436_v43 }
  0x9c   :  { %v216_v60 = vsel %vm200_vm11, %v212_v59, 0.0  ;;  %v437_v61 = vld [vmem:[#allocation3 + $0x28] sm:$0xff] }
  0x9d   :  { %v220_v62 = vrot.slane %v216_v60, 4  ;;  %226 = vst [vmem:[#allocation3 + $0x80] sm:$0xf0] %v216_v60  ;;  %568 = vmatpush1.msra.mxu1 %v437_v61 }
  0x9e   :  { %v205_v44 = vpop.permute.xlu1 %204  ;;  %v435_v63 = vld [vmem:[#allocation3 + $0x8] sm:$0xff]  ;;  %v117_v0 = vpop.permute.xlu0 %116 }
  0x9f   :  { %224 = vst [vmem:[#allocation3 + $0x68] sm:$0xf0] %v220_v62  ;;  %v211_v1 = vsel %vm210_vm9, %v205_v44, %v207_v33  ;;  %497 = vmatpush1.msra.mxu0 %v435_v63 }
  0xa0   :  { %v215_v2 = vsel %vm199_vm10, %v211_v1, 0.0 }
  0xa1   :  { %v219_v4 = vrot.slane %v215_v2, 4  ;;  %225 = vst [vmem:[#allocation3 + $0x78] sm:$0xf0] %v215_v2 }
  0xa2   :  { %v75_v42 = vpop.permute.xlu1 %74  ;;  %v71_v45 = vpop.permute.xlu0 %70 }
  0xa3   :  { %223 = vst [vmem:[#allocation3 + $0x30] sm:$0xf0] %v219_v4  ;;  %v78_v5 = vsel %vm76_vm12, %v73_v58, %v75_v42  ;;  %v77_v6 = vsel %vm76_vm12, %v71_v45, %v73_v58 }
  0xa4   :  { %v82_v7 = vsel %vm66_vm13, %v78_v5, 0.0  ;;  %v434_v8 = vld [vmem:[#allocation3 + $0x80] sm:$0xff]  ;;  %v81_v9 = vsel %vm65_vm14, %v77_v6, 0.0 }
  0xa5   :  { %84 = vst [vmem:[#allocation3 + $0x38] sm:$0xf] %v82_v7  ;;  %v88_v10 = vrot.slane %v82_v7, 4  ;;  %569 = vmatprep.subr.mxu1 %v434_v8  ;;  %83 = vst [vmem:[#allocation3] sm:$0xf] %v81_v9  ;;  %v87_v47 = vrot.slane %v81_v9, 4 }
  0xa6   :  { %v119_v46 = vpop.permute.xlu1 %118  ;;  %v432_v48 = vld [vmem:[#allocation3 + $0x68] sm:$0xff] }
  0xa7   :  { %92 = vst [vmem:[#allocation3 + $0x18] sm:$0xf] %v88_v10  ;;  %v122_v11 = vsel %vm120_vm15, %v117_v0, %v119_v46  ;;  %498 = vmatprep.subr.mxu0 %v432_v48  ;;  %91 = vst [vmem:[#allocation3 + $0x50] sm:$0xf] %v87_v47 }
  0xa8   :  { %v126_v12 = vsel %vm110_vm2, %v122_v11, 0.0  ;;  %v433_v13 = vld [vmem:[#allocation3 + $0x78] sm:$0xff] }
  0xa9   :  { %v130_v17 = vrot.slane %v126_v12, 4  ;;  %136 = vst [vmem:[#allocation3 + $0x18] sm:$0xf0] %v126_v12  ;;  %570 = vmatpush1.msra.mxu1 %v433_v13 }
  0xaa   :  { %v115_v14 = vpop.permute.xlu1 %114  ;;  %v431_v50 = vld [vmem:[#allocation3 + $0x30] sm:$0xff] }
  0xab   :  { %134 = vst [vmem:[#allocation3 + $0x38] sm:$0xf0] %v130_v17  ;;  %v121_v18 = vsel %vm120_vm15, %v115_v14, %v117_v0  ;;  %499 = vmatpush1.msra.mxu0 %v431_v50 }
  0xac   :  { %v125_v19 = vsel %vm109_vm4, %v121_v18, 0.0 }
  0xad   :  { %v129_v21 = vrot.slane %v125_v19, 4  ;;  %135 = vst [vmem:[#allocation3 + $0x50] sm:$0xf0] %v125_v19 }
  0xaf   :  { %133 = vst [vmem:[#allocation3] sm:$0xf0] %v129_v21  ;;  %v451_v16 = vpop.permute.xlu0 %450 }
  0xb0   :  { %v430_v22 = vld [vmem:[#allocation3 + $0x18] sm:$0xff] }
  0xb1   :  { %571 = vmatprep.subr.mxu1 %v430_v22 }
  0xb2   :  { %v428_v23 = vld [vmem:[#allocation3 + $0x38] sm:$0xff] }
  0xb3   :  { %500 = vmatprep.subr.mxu0 %v428_v23 }
  0xb4   :  { %v429_v15 = vld [vmem:[#allocation3 + $0x50] sm:$0xff] }
  0xb5   :  { %572 = vmatpush1.msra.mxu1 %v429_v15 }
  0xb6   :  { %810 = vmatmul.mubr.msk.f32.vlgmr.msra.gmra.mxu1 %vm453_vm6, %v426_v24  ;;  %v427_v49 = vld [vmem:[#allocation3] sm:$0xff] }
  0xb7   :  { %501 = vmatpush1.msra.mxu0 %v427_v49  ;;  %775 = vmatprep.mubr.f32.mxu1 %v855_v3 }
  0xb8   :  { %807 = vmatmul.mubr.msk.f32.vlgmr.msra.gmra.mxu0 %vm453_vm6, %v426_v24 }
  0xb9   :  { %704 = vmatprep.mubr.f32.mxu0 %v855_v3  ;;  %v616_v3 = vld [vmem:[%s1184_s4] sm:$0xff]  ;;  %s833_s4 = scalar_lea.vmem %s793_s17, 512 }
  0xba   :  { %p834_p0 = scmp.ne.s32.totalorder %s793_s17, %s833_s4  ;;  %p839_p2 = scmp.lt.s32.totalorder %s833_s4, %s833_s4 }
  0xbc   :  { %p840_p3 = por %p839_p2, %p838_p1 }
  0xbe   :  { %p841_p4 = pnand %p840_p3, %p834_p0 }
 0x108   :  { %v621_v38 = vpop.permute.xlu1 %620 }
 0x176   :  { %v607_v20 = vpop.f32.mrf.mxu1 }
 0x177   :  { %v608_v25 = vadd.f32 %v607_v20, %v451_v16 }
 0x178   :  { %v536_v26 = vpop.f32.mrf.mxu0  ;;  %v609_v27 = vpop.f32.mrf.mxu1 }
 0x179   :  { %v610_v28 = vadd.f32 %v609_v27, %v451_v16  ;;  %v537_v29 = vadd.f32 %v536_v26, %v451_v16  ;;  %v614_v30 = vmax.f32 %v608_v25, 0.0 }
 0x17a   :  { %v538_v31 = vpop.f32.mrf.mxu0 }
 0x17b   :  { %v615_v33 = vmax.f32 %v610_v28, 0.0  ;;  %v539_v34 = vadd.f32 %v538_v31, %v451_v16  ;;  %v612_v37 = vmax.f32 %v537_v29, 0.0 }
 0x17d   :  { %v613_v36 = vmax.f32 %v539_v34, 0.0  ;;  %814 = vmatprep.subr.msk.mxu1 %vm627_vm8, %v615_v33 }
 0x17e   :  { %815 = vmatpush1.msk.msra.mxu1 %vm627_vm8, %v614_v30 }
 0x17f   :  { %811 = vmatprep.subr.msk.mxu0 %vm627_vm8, %v613_v36  ;;  %816 = vmatmul.mubr.msk.f32.vlgmr.msra.gmra.mxu1 %vm623_vm5, %v616_v3 }
 0x180   :  { %812 = vmatpush1.msk.msra.mxu0 %vm627_vm8, %v612_v37 }
 0x181   :  { %813 = vmatmul.mubr.msk.f32.vlgmr.msra.gmra.mxu0 %vm623_vm5, %v616_v3 }
 0x23f   :  { %v777_v32 = vpop.f32.mrf.mxu1 }
 0x240   :  { %v778_v35 = vadd.f32 %v777_v32, %v621_v38 }
 0x241   :  { %v706_v39 = vpop.f32.mrf.mxu0  ;;  %v779_v52 = vpop.f32.mrf.mxu1 }
 0x242   :  { %v707_v53 = vadd.f32 %v706_v39, %v621_v38  ;;  %785 = vst [vmem:[#allocation4 + $0x10] sm:$0xff] %v778_v35  ;;  %v780_v54 = vadd.f32 %v779_v52, %v621_v38 }
 0x243   :  { %v708_v55 = vpop.f32.mrf.mxu0 }
 0x244   :  { %782 = vst [vmem:[#allocation4] sm:$0xff] %v707_v53  ;;  %v709_v56 = vadd.f32 %v708_v55, %v621_v38  ;;  %786 = vst [vmem:[#allocation4 + $0x18] sm:$0xff] %v780_v54 }
 0x246   :  { %783 = vst [vmem:[#allocation4 + $0x8] sm:$0xff] %v709_v56 }
 0x247   :  { %844 = shalt.err (!%p841_p4)
}
 0x248   :  { %s866_s18 = smov 256  }
 0x249   :  { %798 = dma.vmem_to_hbm [thread:$0]  %s793_s17, 512, %s1186_s6, [#allocation5], %s866_s18, %s866_s18, %s864_s10  }
 0x24a   :  { %853 = dma.done.wait [#allocation5], 512  }
 0x24b   :  { %854 = vsyncadd [#allocation5], 4294966784 }
 0x24c   :  { %802 = vsyncpa [#allocation5], 1 }

</bundles_post_ra>
